<compile_context>
chip_gen: v6e
topology: v6e:2x2x1
jax: 0.10.0
libtpu: 0.0.40
codegen_flags: <defaults>
</compile_context>

<pallas_src>
import jax
import jax.numpy as jnp
import numpy as np
from jax.experimental import pallas as pl
from jax.experimental.pallas import tpu as pltpu

# Keep fully-resident weights comfortably inside VMEM even on v7x (64 MiB/TC);
# above this budget the hidden axis is streamed in _HIDDEN_CHUNK-wide tiles.
_WEIGHT_VMEM_BUDGET = 16 * 1024 * 1024
_HIDDEN_CHUNK = 512          # multiple of 256: feeds the 256x256 MXU on v6e/v7x


def _round_up(x, m):
    return (x + m - 1) // m * m


def _choose_tile_h(dim, hidden, w_itemsize):
    if 2 * dim * hidden * w_itemsize <= _WEIGHT_VMEM_BUDGET:
        return hidden                       # single resident hidden tile
    return _HIDDEN_CHUNK


def prepare_mlp_params(w_up, b_up, w_down, b_down, *, mxu_dtype=jnp.bfloat16):
    """One-time weight prep (cast to MXU dtype; pad hidden only if streamed).

    Call once at init, NOT per forward call.
      w_up: [dim, hidden]  b_up: [hidden]  w_down: [hidden, dim]  b_down: [dim]
    """
    dim, hidden = w_up.shape
    w_itemsize = np.dtype(mxu_dtype).itemsize
    tile_h = _choose_tile_h(dim, hidden, w_itemsize)
    hidden_p = _round_up(hidden, tile_h)

    wu = w_up.astype(mxu_dtype)
    wd = w_down.astype(mxu_dtype)
    bu = b_up.astype(jnp.float32).reshape(1, hidden)
    bd = b_down.astype(jnp.float32).reshape(1, dim)
    if hidden_p != hidden:
        # Exact zero padding: padded hidden units have 0 weight + 0 bias,
        # SiLU(0) = 0, and zero rows of w_down contribute nothing.
        wu = jnp.zeros((dim, hidden_p), mxu_dtype).at[:, :hidden].set(wu)
        wd = jnp.zeros((hidden_p, dim), mxu_dtype).at[:hidden, :].set(wd)
        bu = jnp.zeros((1, hidden_p), jnp.float32).at[:, :hidden].set(bu)
    return dict(w_up=wu, b_up=bu, w_down=wd, b_down=bd,
                dim=dim, hidden=hidden, tile_h=tile_h)


def _mlp_kernel(x_ref, wu_ref, bu_ref, wd_ref, bd_ref, o_ref, acc_ref):
    k = pl.program_id(1)

    @pl.when(k == 0)
    def _():
        acc_ref[...] = jnp.zeros_like(acc_ref)

    # up-projection (MXU; bf16 operands cast in VMEM, f32 accumulation)
    h = jnp.dot(x_ref[...].astype(wu_ref.dtype), wu_ref[...],
                preferred_element_type=jnp.float32)
    h = h + bu_ref[...]                         # f32 bias, broadcast over rows
    h = h * jax.nn.sigmoid(h)                   # SiLU in f32 (VPU mul + EUP)
    # down-projection (MXU), accumulated over hidden tiles in f32
    acc_ref[...] += jnp.dot(h.astype(wd_ref.dtype), wd_ref[...],
                            preferred_element_type=jnp.float32)

    @pl.when(k == pl.num_programs(1) - 1)
    def _():
        # dropout is identity (dropout=None in the reference module)
        o_ref[...] = (acc_ref[...] + bd_ref[...]).astype(o_ref.dtype)


def mlp_pallas(x, params, *, tile_m=256):
    """x: [..., dim] -> [..., dim] (same dtype as x). `params` from prepare_mlp_params."""
    w_up, b_up = params["w_up"], params["b_up"]
    w_down, b_down = params["w_down"], params["b_down"]
    dim, tile_h = params["dim"], params["tile_h"]
    hidden_p = w_up.shape[1]
    assert x.shape[-1] == dim

    lead = x.shape[:-1]
    out_dtype = x.dtype
    x2 = x.reshape(-1, dim)
    M = x2.shape[0]

    # Row tile: multiple of 16 (bf16 sublane packing). Split so the "parallel"
    # M axis gets >=2 grid steps whenever possible (v7x megacore sharding).
    # The last block may be partial (cdiv grid) -> no dead-row padding of M.
    tm = min(tile_m, _round_up(M, 16))
    if pl.cdiv(M, tm) < 2 and tm >= 32:
        tm = _round_up(pl.cdiv(M, 2), 16)
    n_m = pl.cdiv(M, tm)
    n_h = hidden_p // tile_h
    resident = n_h == 1                      # weights fully VMEM-resident

    w_itemsize = np.dtype(w_up.dtype).itemsize
    out_itemsize = np.dtype(out_dtype).itemsize
    cost = pl.CostEstimate(
        flops=4 * M * dim * hidden_p,                       # two matmuls
        transcendentals=M * hidden_p,                       # sigmoid
        bytes_accessed=(M * dim * x.dtype.itemsize          # x in
                        + 2 * dim * hidden_p * w_itemsize   # weights
                        + (hidden_p + dim) * 4              # biases
                        + M * dim * out_itemsize),          # out
    )

    # VMEM need: double-buffered x/out tiles, weight/bias tiles (single copy
    # when resident), f32 accumulator; x2 headroom for Mosaic internal scratch.
    # Cap below v7x's 64 MiB physical VMEM (v5e/v6e have 128 MiB).
    w_bufs = 1 if resident else 2
    need = (2 * tm * dim * (x.dtype.itemsize + out_itemsize)
            + w_bufs * (2 * dim * tile_h * w_itemsize + tile_h * 4)
            + dim * 4
            + tm * dim * 4)
    vmem_limit = min(max(2 * need, 32 * 1024 * 1024), 56 * 1024 * 1024)

    def build(single_buffer_consts):
        const_mode = ({"pipeline_mode": pl.Buffered(1)}
                      if single_buffer_consts else {})
        in_specs = [
            pl.BlockSpec((tm, dim), lambda i, k: (i, 0)),              # x streams over M
            pl.BlockSpec((dim, tile_h), lambda i, k: (0, k), **const_mode),   # w_up
            pl.BlockSpec((1, tile_h), lambda i, k: (0, k), **const_mode),     # b_up
            pl.BlockSpec((tile_h, dim), lambda i, k: (k, 0), **const_mode),   # w_down
            pl.BlockSpec((1, dim), lambda i, k: (0, 0), **const_mode),        # b_down
        ]
        return pl.pallas_call(
            _mlp_kernel,
            out_shape=jax.ShapeDtypeStruct((M, dim), out_dtype),   # unpadded, final dtype
            grid=(n_m, n_h),
            in_specs=in_specs,
            out_specs=pl.BlockSpec((tm, dim), lambda i, k: (i, 0)),
            scratch_shapes=[pltpu.VMEM((tm, dim), jnp.float32)],   # f32 accumulator
            compiler_params=pltpu.CompilerParams(
                dimension_semantics=("parallel", "arbitrary"),
                vmem_limit_bytes=vmem_limit,
            ),
            cost_estimate=cost,
        )

    try:
        # Single-buffer the constant (resident) weight/bias blocks: v7x VMEM headroom.
        out = build(resident)(x2, w_up, b_up, w_down, b_down)
    except Exception:
        # Fallback if this jax/Mosaic build rejects pl.Buffered(1) on these specs.
        out = build(False)(x2, w_up, b_up, w_down, b_down)

    return out.reshape(*lead, dim)


def _mlp_reference_f32(x, w_up, b_up, w_down, b_down):
    h = x @ w_up + b_up
    h = h * jax.nn.sigmoid(h)
    return h @ w_down + b_down


def _mlp_reference_bf16(x, w_up, b_up, w_down, b_down):
    # Same numerics as the kernel: bf16 MXU operands, f32 accumulation/activation.
    h = jnp.dot(x.astype(jnp.bfloat16), w_up.astype(jnp.bfloat16),
                preferred_element_type=jnp.float32) + b_up
    h = h * jax.nn.sigmoid(h)
    return jnp.dot(h.astype(jnp.bfloat16), w_down.astype(jnp.bfloat16),
                   preferred_element_type=jnp.float32) + b_down


if __name__ == "__main__":
    # Module hyperparams (matches MLP(dim=32) defaults):
    dim = 32
    hidden_dim = 4 * dim
    hidden_dim = int(2 * hidden_dim / 3)
    multiple_of = 4
    hidden_dim = multiple_of * ((hidden_dim + multiple_of - 1) // multiple_of)  # -> 88

    batch, seq = 2, 8
    key = jax.random.PRNGKey(0)
    k_x, k_wu, k_bu, k_wd, k_bd = jax.random.split(key, 5)

    x = jax.random.normal(k_x, (batch, seq, dim), dtype=jnp.float32)
    # nn.Linear stores up: (hidden, dim), down: (dim, hidden); we keep the
    # transposed layout so the kernel does plain x @ W + b.
    w_up = jax.random.normal(k_wu, (dim, hidden_dim), dtype=jnp.float32) * 0.05
    b_up = jax.random.normal(k_bu, (hidden_dim,), dtype=jnp.float32) * 0.05
    w_down = jax.random.normal(k_wd, (hidden_dim, dim), dtype=jnp.float32) * 0.05
    b_down = jax.random.normal(k_bd, (dim,), dtype=jnp.float32) * 0.05

    params = prepare_mlp_params(w_up, b_up, w_down, b_down)   # once-only cast/prep

    out = mlp_pallas(x, params)
    out = jax.block_until_ready(out)
    assert out.shape == (batch, seq, dim)
    assert out.dtype == x.dtype

    x2d = x.reshape(batch * seq, dim)
    ref_bf16 = _mlp_reference_bf16(x2d, w_up, b_up, w_down, b_down).reshape(batch, seq, dim)
    ref_f32 = _mlp_reference_f32(x2d, w_up, b_up, w_down, b_down).reshape(batch, seq, dim)
    assert jnp.allclose(out, ref_bf16, atol=1e-3, rtol=1e-3), "mismatch vs bf16-matmul reference"
    assert jnp.allclose(out, ref_f32, atol=3e-2, rtol=3e-2), "mismatch vs f32 reference"

    # Ragged row count: exercises the cdiv grid / partial last M block.
    x_ragged = jax.random.normal(jax.random.PRNGKey(1), (3, 5, dim), dtype=jnp.float32)
    out_r = jax.block_until_ready(mlp_pallas(x_ragged, params))
    ref_r = _mlp_reference_bf16(x_ragged.reshape(-1, dim), w_up, b_up, w_down,
                                b_down).reshape(3, 5, dim)
    assert jnp.allclose(out_r, ref_r, atol=1e-3, rtol=1e-3), "ragged-M mismatch"

    print("KERNEL_OK")
</pallas_src>

<mosaic_0001>
module attributes {stable_mosaic.version = 11 : i64} {
  func.func @_mlp_kernel(%arg0: i32, %arg1: i32, %arg2: memref<16x32xf32, #tpu.memory_space<vmem>>, %arg3: memref<32x88xbf16, #tpu.memory_space<vmem>>, %arg4: memref<1x88xf32, #tpu.memory_space<vmem>>, %arg5: memref<88x32xbf16, #tpu.memory_space<vmem>>, %arg6: memref<1x32xf32, #tpu.memory_space<vmem>>, %arg7: memref<16x32xf32, #tpu.memory_space<vmem>>, %arg8: memref<16x32xf32, #tpu.memory_space<vmem>>) attributes {dimension_semantics = [#tpu.dimension_semantics<parallel>, #tpu.dimension_semantics<arbitrary>], iteration_bounds = array<i64: 1, 1>, scalar_prefetch = 0 : i64, scratch_operands = 1 : i64, tpu.core_type = #tpu.core_type<tc>, window_params = [{transform_indices = @transform_0, window_bounds = array<i64: 16, 32>}, {pipeline_mode = #tpu.pipeline_mode<synchronous>, transform_indices = @transform_1, window_bounds = array<i64: 32, 88>}, {pipeline_mode = #tpu.pipeline_mode<synchronous>, transform_indices = @transform_2, window_bounds = array<i64: 1, 88>}, {pipeline_mode = #tpu.pipeline_mode<synchronous>, transform_indices = @transform_3, window_bounds = array<i64: 88, 32>}, {pipeline_mode = #tpu.pipeline_mode<synchronous>, transform_indices = @transform_4, window_bounds = array<i64: 1, 32>}, {transform_indices = @transform_5, window_bounds = array<i64: 16, 32>}]} {
    %c0_i32 = arith.constant 0 : i32
    %0 = arith.cmpi eq, %arg1, %c0_i32 : i32
    %1 = arith.extui %0 : i1 to i32
    %c0_i32_0 = arith.constant 0 : i32
    %2 = arith.cmpi ne, %1, %c0_i32_0 : i32
    scf.if %2 {
      %cst_16 = arith.constant 0.000000e+00 : f32
      %25 = vector.broadcast %cst_16 : f32 to vector<16x32xf32>
      %c0_17 = arith.constant 0 : index
      %c0_18 = arith.constant 0 : index
      %26 = vector.load %arg8[%c0_17, %c0_18] : memref<16x32xf32, #tpu.memory_space<vmem>>, vector<16x32xf32>
      tpu.vector_store %arg8[%c0_17, %c0_18], %25 {strides = array<i32>} : memref<16x32xf32, #tpu.memory_space<vmem>>, vector<16x32xf32>,
    } else {
    }
    %c0 = arith.constant 0 : index
    %c0_1 = arith.constant 0 : index
    %3 = vector.load %arg2[%c0, %c0_1] : memref<16x32xf32, #tpu.memory_space<vmem>>, vector<16x32xf32>
    %4 = arith.truncf %3 : vector<16x32xf32> to vector<16x32xbf16>
    %c0_2 = arith.constant 0 : index
    %c0_3 = arith.constant 0 : index
    %5 = vector.load %arg3[%c0_2, %c0_3] : memref<32x88xbf16, #tpu.memory_space<vmem>>, vector<32x88xbf16>
    %cst = arith.constant dense<0.000000e+00> : vector<16x88xf32>
    %6 = tpu.matmul %4, %5, %cst {dimension_numbers = #tpu.dot_dimension_numbers<[1], [0], [0], [1], [0, 0, 1, 1], [], []>} : vector<16x32xbf16>, vector<32x88xbf16>, vector<16x88xf32> -> vector<16x88xf32>
    %c0_4 = arith.constant 0 : index
    %c0_5 = arith.constant 0 : index
    %7 = vector.load %arg4[%c0_4, %c0_5] : memref<1x88xf32, #tpu.memory_space<vmem>>, vector<1x88xf32>
    %8 = vector.broadcast %7 : vector<1x88xf32> to vector<16x88xf32>
    %9 = arith.addf %6, %8 : vector<16x88xf32>
    %10 = arith.negf %9 : vector<16x88xf32>
    %11 = math.exp %10 : vector<16x88xf32>
    %cst_6 = arith.constant 1.000000e+00 : f32
    %12 = vector.broadcast %cst_6 : f32 to vector<16x88xf32>
    %13 = arith.addf %12, %11 : vector<16x88xf32>
    %14 = arith.divf %12, %13 : vector<16x88xf32>
    %15 = arith.mulf %9, %14 : vector<16x88xf32>
    %c0_7 = arith.constant 0 : index
    %c0_8 = arith.constant 0 : index
    %16 = vector.load %arg8[%c0_7, %c0_8] : memref<16x32xf32, #tpu.memory_space<vmem>>, vector<16x32xf32>
    %17 = arith.truncf %15 : vector<16x88xf32> to vector<16x88xbf16>
    %c0_9 = arith.constant 0 : index
    %c0_10 = arith.constant 0 : index
    %18 = vector.load %arg5[%c0_9, %c0_10] : memref<88x32xbf16, #tpu.memory_space<vmem>>, vector<88x32xbf16>
    %cst_11 = arith.constant dense<0.000000e+00> : vector<16x32xf32>
    %19 = tpu.matmul %17, %18, %cst_11 {dimension_numbers = #tpu.dot_dimension_numbers<[1], [0], [0], [1], [0, 0, 1, 1], [], []>} : vector<16x88xbf16>, vector<88x32xbf16>, vector<16x32xf32> -> vector<16x32xf32>
    %20 = arith.addf %16, %19 : vector<16x32xf32>
    %c0_12 = arith.constant 0 : index
    %c0_13 = arith.constant 0 : index
    %21 = vector.load %arg8[%c0_12, %c0_13] : memref<16x32xf32, #tpu.memory_space<vmem>>, vector<16x32xf32>
    tpu.vector_store %arg8[%c0_12, %c0_13], %20 {strides = array<i32>} : memref<16x32xf32, #tpu.memory_space<vmem>>, vector<16x32xf32>,
    %c0_i32_14 = arith.constant 0 : i32
    %22 = arith.cmpi eq, %arg1, %c0_i32_14 : i32
    %23 = arith.extui %22 : i1 to i32
    %c0_i32_15 = arith.constant 0 : i32
    %24 = arith.cmpi ne, %23, %c0_i32_15 : i32
    scf.if %24 {
      %c0_16 = arith.constant 0 : index
      %c0_17 = arith.constant 0 : index
      %25 = vector.load %arg8[%c0_16, %c0_17] : memref<16x32xf32, #tpu.memory_space<vmem>>, vector<16x32xf32>
      %c0_18 = arith.constant 0 : index
      %c0_19 = arith.constant 0 : index
      %26 = vector.load %arg6[%c0_18, %c0_19] : memref<1x32xf32, #tpu.memory_space<vmem>>, vector<1x32xf32>
      %27 = vector.broadcast %26 : vector<1x32xf32> to vector<16x32xf32>
      %28 = arith.addf %25, %27 : vector<16x32xf32>
      %c0_20 = arith.constant 0 : index
      %c0_21 = arith.constant 0 : index
      %29 = vector.load %arg7[%c0_20, %c0_21] : memref<16x32xf32, #tpu.memory_space<vmem>>, vector<16x32xf32>
      tpu.vector_store %arg7[%c0_20, %c0_21], %28 {strides = array<i32>} : memref<16x32xf32, #tpu.memory_space<vmem>>, vector<16x32xf32>,
    } else {
    }
    return
  }
  func.func @transform_0(%arg0: i32, %arg1: i32) -> (i32, i32) {
    %c0_i32 = arith.constant 0 : i32
    %c0_i32_0 = arith.constant 0 : i32
    return %arg0, %c0_i32 : i32, i32
  }
  func.func @transform_1(%arg0: i32, %arg1: i32) -> (i32, i32) {
    %c0_i32 = arith.constant 0 : i32
    %c0_i32_0 = arith.constant 0 : i32
    return %c0_i32, %arg1 : i32, i32
  }
  func.func @transform_2(%arg0: i32, %arg1: i32) -> (i32, i32) {
    %c0_i32 = arith.constant 0 : i32
    %c0_i32_0 = arith.constant 0 : i32
    return %c0_i32, %arg1 : i32, i32
  }
  func.func @transform_3(%arg0: i32, %arg1: i32) -> (i32, i32) {
    %c0_i32 = arith.constant 0 : i32
    %c0_i32_0 = arith.constant 0 : i32
    return %arg1, %c0_i32 : i32, i32
  }
  func.func @transform_4(%arg0: i32, %arg1: i32) -> (i32, i32) {
    %c0_i32 = arith.constant 0 : i32
    %c0_i32_0 = arith.constant 0 : i32
    %c0_i32_1 = arith.constant 0 : i32
    return %c0_i32, %c0_i32_0 : i32, i32
  }
  func.func @transform_5(%arg0: i32, %arg1: i32) -> (i32, i32) {
    %c0_i32 = arith.constant 0 : i32
    %c0_i32_0 = arith.constant 0 : i32
    return %arg0, %c0_i32 : i32, i32
  }
}

module attributes {stable_mosaic.version = 11 : i64} {
  func.func @_mlp_kernel(%arg0: i32, %arg1: i32, %arg2: memref<16x32xf32, #tpu.memory_space<vmem>>, %arg3: memref<32x88xbf16, #tpu.memory_space<vmem>>, %arg4: memref<1x88xf32, #tpu.memory_space<vmem>>, %arg5: memref<88x32xbf16, #tpu.memory_space<vmem>>, %arg6: memref<1x32xf32, #tpu.memory_space<vmem>>, %arg7: memref<16x32xf32, #tpu.memory_space<vmem>>, %arg8: memref<16x32xf32, #tpu.memory_space<vmem>>) attributes {dimension_semantics = [#tpu.dimension_semantics<parallel>, #tpu.dimension_semantics<arbitrary>], iteration_bounds = array<i64: 1, 1>, scalar_prefetch = 0 : i64, scratch_operands = 1 : i64, tpu.core_type = #tpu.core_type<tc>, window_params = [{transform_indices = @transform_0, window_bounds = array<i64: 16, 32>}, {transform_indices = @transform_1, window_bounds = array<i64: 32, 88>}, {transform_indices = @transform_2, window_bounds = array<i64: 1, 88>}, {transform_indices = @transform_3, window_bounds = array<i64: 88, 32>}, {pipeline_mode = #tpu.pipeline_mode<synchronous>, transform_indices = @transform_4, window_bounds = array<i64: 1, 32>}, {transform_indices = @transform_5, window_bounds = array<i64: 16, 32>}]} {
    %c0_i32 = arith.constant 0 : i32
    %0 = arith.cmpi eq, %arg1, %c0_i32 : i32
    %1 = arith.extui %0 : i1 to i32
    %c0_i32_0 = arith.constant 0 : i32
    %2 = arith.cmpi ne, %1, %c0_i32_0 : i32
    scf.if %2 {
      %cst_16 = arith.constant 0.000000e+00 : f32
      %25 = vector.broadcast %cst_16 : f32 to vector<16x32xf32>
      %c0_17 = arith.constant 0 : index
      %c0_18 = arith.constant 0 : index
      %26 = vector.load %arg8[%c0_17, %c0_18] : memref<16x32xf32, #tpu.memory_space<vmem>>, vector<16x32xf32>
      tpu.vector_store %arg8[%c0_17, %c0_18], %25 {strides = array<i32>} : memref<16x32xf32, #tpu.memory_space<vmem>>, vector<16x32xf32>,
    } else {
    }
    %c0 = arith.constant 0 : index
    %c0_1 = arith.constant 0 : index
    %3 = vector.load %arg2[%c0, %c0_1] : memref<16x32xf32, #tpu.memory_space<vmem>>, vector<16x32xf32>
    %4 = arith.truncf %3 : vector<16x32xf32> to vector<16x32xbf16>
    %c0_2 = arith.constant 0 : index
    %c0_3 = arith.constant 0 : index
    %5 = vector.load %arg3[%c0_2, %c0_3] : memref<32x88xbf16, #tpu.memory_space<vmem>>, vector<32x88xbf16>
    %cst = arith.constant dense<0.000000e+00> : vector<16x88xf32>
    %6 = tpu.matmul %4, %5, %cst {dimension_numbers = #tpu.dot_dimension_numbers<[1], [0], [0], [1], [0, 0, 1, 1], [], []>} : vector<16x32xbf16>, vector<32x88xbf16>, vector<16x88xf32> -> vector<16x88xf32>
    %c0_4 = arith.constant 0 : index
    %c0_5 = arith.constant 0 : index
    %7 = vector.load %arg4[%c0_4, %c0_5] : memref<1x88xf32, #tpu.memory_space<vmem>>, vector<1x88xf32>
    %8 = vector.broadcast %7 : vector<1x88xf32> to vector<16x88xf32>
    %9 = arith.addf %6, %8 : vector<16x88xf32>
    %10 = arith.negf %9 : vector<16x88xf32>
    %11 = math.exp %10 : vector<16x88xf32>
    %cst_6 = arith.constant 1.000000e+00 : f32
    %12 = vector.broadcast %cst_6 : f32 to vector<16x88xf32>
    %13 = arith.addf %12, %11 : vector<16x88xf32>
    %14 = arith.divf %12, %13 : vector<16x88xf32>
    %15 = arith.mulf %9, %14 : vector<16x88xf32>
    %c0_7 = arith.constant 0 : index
    %c0_8 = arith.constant 0 : index
    %16 = vector.load %arg8[%c0_7, %c0_8] : memref<16x32xf32, #tpu.memory_space<vmem>>, vector<16x32xf32>
    %17 = arith.truncf %15 : vector<16x88xf32> to vector<16x88xbf16>
    %c0_9 = arith.constant 0 : index
    %c0_10 = arith.constant 0 : index
    %18 = vector.load %arg5[%c0_9, %c0_10] : memref<88x32xbf16, #tpu.memory_space<vmem>>, vector<88x32xbf16>
    %cst_11 = arith.constant dense<0.000000e+00> : vector<16x32xf32>
    %19 = tpu.matmul %17, %18, %cst_11 {dimension_numbers = #tpu.dot_dimension_numbers<[1], [0], [0], [1], [0, 0, 1, 1], [], []>} : vector<16x88xbf16>, vector<88x32xbf16>, vector<16x32xf32> -> vector<16x32xf32>
    %20 = arith.addf %16, %19 : vector<16x32xf32>
    %c0_12 = arith.constant 0 : index
    %c0_13 = arith.constant 0 : index
    %21 = vector.load %arg8[%c0_12, %c0_13] : memref<16x32xf32, #tpu.memory_space<vmem>>, vector<16x32xf32>
    tpu.vector_store %arg8[%c0_12, %c0_13], %20 {strides = array<i32>} : memref<16x32xf32, #tpu.memory_space<vmem>>, vector<16x32xf32>,
    %c0_i32_14 = arith.constant 0 : i32
    %22 = arith.cmpi eq, %arg1, %c0_i32_14 : i32
    %23 = arith.extui %22 : i1 to i32
    %c0_i32_15 = arith.constant 0 : i32
    %24 = arith.cmpi ne, %23, %c0_i32_15 : i32
    scf.if %24 {
      %c0_16 = arith.constant 0 : index
      %c0_17 = arith.constant 0 : index
      %25 = vector.load %arg8[%c0_16, %c0_17] : memref<16x32xf32, #tpu.memory_space<vmem>>, vector<16x32xf32>
      %c0_18 = arith.constant 0 : index
      %c0_19 = arith.constant 0 : index
      %26 = vector.load %arg6[%c0_18, %c0_19] : memref<1x32xf32, #tpu.memory_space<vmem>>, vector<1x32xf32>
      %27 = vector.broadcast %26 : vector<1x32xf32> to vector<16x32xf32>
      %28 = arith.addf %25, %27 : vector<16x32xf32>
      %c0_20 = arith.constant 0 : index
      %c0_21 = arith.constant 0 : index
      %29 = vector.load %arg7[%c0_20, %c0_21] : memref<16x32xf32, #tpu.memory_space<vmem>>, vector<16x32xf32>
      tpu.vector_store %arg7[%c0_20, %c0_21], %28 {strides = array<i32>} : memref<16x32xf32, #tpu.memory_space<vmem>>, vector<16x32xf32>,
    } else {
    }
    return
  }
  func.func @transform_0(%arg0: i32, %arg1: i32) -> (i32, i32) {
    %c0_i32 = arith.constant 0 : i32
    %c0_i32_0 = arith.constant 0 : i32
    return %arg0, %c0_i32 : i32, i32
  }
  func.func @transform_1(%arg0: i32, %arg1: i32) -> (i32, i32) {
    %c0_i32 = arith.constant 0 : i32
    %c0_i32_0 = arith.constant 0 : i32
    return %c0_i32, %arg1 : i32, i32
  }
  func.func @transform_2(%arg0: i32, %arg1: i32) -> (i32, i32) {
    %c0_i32 = arith.constant 0 : i32
    %c0_i32_0 = arith.constant 0 : i32
    return %c0_i32, %arg1 : i32, i32
  }
  func.func @transform_3(%arg0: i32, %arg1: i32) -> (i32, i32) {
    %c0_i32 = arith.constant 0 : i32
    %c0_i32_0 = arith.constant 0 : i32
    return %arg1, %c0_i32 : i32, i32
  }
  func.func @transform_4(%arg0: i32, %arg1: i32) -> (i32, i32) {
    %c0_i32 = arith.constant 0 : i32
    %c0_i32_0 = arith.constant 0 : i32
    %c0_i32_1 = arith.constant 0 : i32
    return %c0_i32, %c0_i32_0 : i32, i32
  }
  func.func @transform_5(%arg0: i32, %arg1: i32) -> (i32, i32) {
    %c0_i32 = arith.constant 0 : i32
    %c0_i32_0 = arith.constant 0 : i32
    return %arg0, %c0_i32 : i32, i32
  }
}

</mosaic_0001>

<bundles_post_ra>
// kernel: tpu_custom_call.1
= control target key start
LH: loop header
LB: loop body
LE: loop exit
PB: predicated region body
PF: predicated region fallthrough
CT: control target
= control target key end

     0   :  { %v337_v1 = vmov 0.0   ;;  %vm338_vm0 = vmmov 0   ;;  %vm26_vm1 = vcmask 261120   ;;  %s418_s0 = inlined_call_operand.vmem [shape: f32[16,32], index: 0, kind: input, shape index: {}]   ;;  %s419_s1 = inlined_call_operand.vmem [shape: bf16[32,88], index: 1, kind: input, shape index: {}]   ;;  %s420_s2 = inlined_call_operand.vmem [shape: f32[1,88], index: 2, kind: input, shape index: {}]   ;;  %s421_s3 = inlined_call_operand.vmem [shape: bf16[88,32], index: 3, kind: input, shape index: {}]   ;;  %s422_s4 = inlined_call_operand.vmem [shape: f32[1,32], index: 4, kind: input, shape index: {}]   ;;  %s423_s5 = inlined_call_operand.hbm [shape: f32[16,32], index: 5, kind: output, shape index: {}]  }
   0x1   :  { %v299_v0 = vld [vmem:[%s419_s1 + $0x8] sm:$0xff]   ;;  %270 = vmatprep.subr.bf16.mxu0 %v337_v1  ;;  %278 = vmatprep.subr.bf16.mxu1 %v337_v1  ;;  %v300_v2 = vld [vmem:[%s419_s1] sm:$0xff]   ;;  %27 = vst.msk [vmem:[#allocation2] sm:$0xff] %vm26_vm1, %v337_v1  ;;  %28 = vst.msk [vmem:[#allocation2 + $0x8] sm:$0xff] %vm26_vm1, %v337_v1 }
   0x2   :  { %271 = vmatpush3.bf16.msra.mxu0 %v299_v0  ;;  %274 = vmatprep.mubr.msk.bf16.mxu0 %vm338_vm0, %v337_v1  ;;  %v29_v3 = vld [vmem:[%s418_s0] sm:$0xff]  ;;  %v30_v4 = vld [vmem:[%s418_s0 + $0x8] sm:$0xff] }
   0x3   :  { %272 = vmatprep.subr.bf16.mxu0 %v337_v1  ;;  %290 = vmatprep.mubr.msk.bf16.mxu1 %vm338_vm0, %v337_v1  ;;  %v31_v5 = vpack.c.bf16 %v30_v4, %v29_v3 }
   0x6   :  { %273 = vmatpush3.bf16.msra.mxu0 %v300_v2 }
   0x7   :  { %10 = vsyncpa [#allocation4], 0  ;;  %v301_v6 = vld [vmem:[%s421_s3 + $0x28] ss:$0 sps:$4 sm:$0xff]   ;;  %vm165_vm2 = vcmask 1043456   ;;  %v302_v8 = vld [vmem:[%s421_s3 + $0x20] sm:$0xff]  }
   0x8   :  { %v167_v7 = vsel %vm165_vm2, %v301_v6, 0  ;;  %v303_v9 = vld [vmem:[%s421_s3 + $0x18] sm:$0xff]   ;;  %v304_v10 = vld [vmem:[%s421_s3 + $0x10] sm:$0xff]   ;;  %v305_v11 = vld [vmem:[%s421_s3 + $0x8] sm:$0xff]   ;;  %vm161_vm3 = vcmask 719872   ;;  %s339_s13 = smov [#allocation3]  }
   0x9   :  { %275 = vmatmul.mubr.msk.bf16.vlgmr.msra.gmra.mxu0 %vm26_vm1, %v31_v5  ;;  %279 = vmatpush3.bf16.msra.mxu1 %v167_v7  ;;  %v306_v12 = vld [vmem:[%s421_s3] sm:$0xff]   ;;  %v115_v35 = vld [vmem:[#allocation2 + $0x8] sm:$0xff]  ;;  %s235_s14 = sshll.u32 %s339_s13, 4  ;;  %s236_s14 = int_to_ptr.vmem [resolvable:$true] %s235_s14 }
   0xa   :  { %280 = vmatprep.subr.bf16.mxu1 %v337_v1  ;;  %v246_v13 = vld [vmem:[%s420_s2] ss:$0 sm:$0xff]  ;;  %s315_s15 = scalar_lea.vmem %s236_s14, 256  ;;  %p320_p1 = scmp.lt.s32.totalorder %s236_s14, %s236_s14 }
   0xb   :  { %v114_v31 = vld [vmem:[#allocation2] sm:$0xff]  ;;  %p316_p0 = scmp.ne.s32.totalorder %s236_s14, %s315_s15  ;;  %p321_p2 = scmp.lt.s32.totalorder %s315_s15, %s315_s15 }
   0xc   :  { %v259_v39 = vld [vmem:[%s422_s4] ss:$0 sm:$0xff] }
   0xd   :  { %281 = vmatpush3.bf16.msra.mxu1 %v302_v8  ;;  %p322_p3 = por %p321_p2, %p320_p1 }
   0xe   :  { %282 = vmatprep.subr.bf16.mxu1 %v337_v1 }
   0xf   :  { %p323_p4 = pnand %p322_p3, %p316_p0 }
  0x11   :  { %283 = vmatpush3.bf16.msra.mxu1 %v303_v9 }
  0x12   :  { %284 = vmatprep.subr.bf16.mxu1 %v337_v1 }
  0x15   :  { %285 = vmatpush3.bf16.msra.mxu1 %v304_v10 }
  0x16   :  { %286 = vmatprep.subr.bf16.mxu1 %v337_v1 }
  0x19   :  { %287 = vmatpush3.bf16.msra.mxu1 %v305_v11 }
  0x1a   :  { %288 = vmatprep.subr.bf16.mxu1 %v337_v1 }
  0x1d   :  { %289 = vmatpush3.bf16.msra.mxu1 %v306_v12 }
  0xc9   :  { %v93_v14 = vpop.f32.mrf.mxu0 }
  0xca   :  { %v94_v15 = vadd.f32 %v246_v13, %v93_v14 }
  0xcb   :  { %v276_v16 = vpop.f32.mrf.mxu0 }
  0xcc   :  { %v250_v17 = vmul.f32 -1.442695, %v94_v15 }
  0xcd   :  { %v96_v18 = vpop.f32.mrf.mxu0 }
  0xce   :  { %307 = vpow2.f32 %v250_v17  ;;  %v97_v19 = vadd.f32 %v246_v13, %v96_v18 }
  0xcf   :  { %v277_v20 = vpop.f32.mrf.mxu0 }
  0xd0   :  { %v251_v21 = vmul.f32 -1.442695, %v97_v19 }
  0xd2   :  { %309 = vpow2.f32 %v251_v21 }
  0xdb   :  { %v308_v22 = vpop.eup %307 }
  0xdc   :  { %v106_v23 = vadd.f32 1.0, %v308_v22 }
  0xde   :  { %311 = vrcp.f32 %v106_v23 }
  0xdf   :  { %v310_v24 = vpop.eup %309 }
  0xe0   :  { %v107_v25 = vadd.f32 1.0, %v310_v24 }
  0xe2   :  { %313 = vrcp.f32 %v107_v25 }
  0xeb   :  { %v312_v26 = vpop.eup %311 }
  0xec   :  { %v112_v28 = vmul.f32 %v312_v26, %v94_v15 }
  0xef   :  { %v314_v27 = vpop.eup %313 }
  0xf0   :  { %v113_v29 = vmul.f32 %v314_v27, %v97_v19 }
  0xf2   :  { %v116_v30 = vpack.c.bf16 %v113_v29, %v112_v28 }
  0xf4   :  { %291 = vmatmul.mubr.msk.bf16.vlgmr.msra.gmra.mxu1 %vm161_vm3, %v116_v30 }
 0x1b4   :  { %v203_v32 = vpop.f32.mrf.mxu1 }
 0x1b5   :  { %v210_v33 = vadd.f32 %v203_v32, %v114_v31 }
 0x1b6   :  { %v292_v34 = vpop.f32.mrf.mxu1 }
 0x1b7   :  { %212 = vst.msk [vmem:[#allocation2] sm:$0xff] %vm26_vm1, %v210_v33 }
 0x1b8   :  { %v206_v36 = vpop.f32.mrf.mxu1 }
 0x1b9   :  { %v211_v37 = vadd.f32 %v206_v36, %v115_v35 }
 0x1ba   :  { %v293_v38 = vpop.f32.mrf.mxu1 }
 0x1bb   :  { %213 = vst.msk [vmem:[#allocation2 + $0x8] sm:$0xff] %vm26_vm1, %v211_v37 }
 0x1be   :  { %v217_v40 = vld [vmem:[#allocation2] sm:$0xff] }
 0x1bf   :  { %v226_v41 = vadd.f32 %v259_v39, %v217_v40 }
 0x1c1   :  { %228 = vst.msk [vmem:[#allocation3] sm:$0xff] %vm26_vm1, %v226_v41 }
 0x1c2   :  { %v218_v42 = vld [vmem:[#allocation2 + $0x8] sm:$0xff] }
 0x1c3   :  { %v227_v43 = vadd.f32 %v259_v39, %v218_v42 }
 0x1c5   :  { %229 = vst.msk [vmem:[#allocation3 + $0x8] sm:$0xff] %vm26_vm1, %v227_v43 }
 0x1c6   :  { %326 = shalt.err (!%p323_p4)
}
 0x1c7   :  { %s340_s16 = smov 128   ;;  %s341_s4 = smov 8  }
 0x1c8   :  { %241 = dma.vmem_to_hbm [thread:$0]  %s236_s14, 256, %s423_s5, [#allocation4], %s340_s16, %s340_s16, %s341_s4  }
 0x1c9   :  { %335 = dma.done.wait [#allocation4], 256  }
 0x1ca   :  { %336 = vsyncadd [#allocation4], 4294967040 }
 0x1cb   :  { %245 = vsyncpa [#allocation4], 1 }

// kernel: tpu_custom_call.1
= control target key start
LH: loop header
LB: loop body
LE: loop exit
PB: predicated region body
PF: predicated region fallthrough
CT: control target
= control target key end

     0   :  { %v337_v1 = vmov 0.0   ;;  %vm338_vm0 = vmmov 0   ;;  %vm26_vm1 = vcmask 261120   ;;  %s418_s0 = inlined_call_operand.vmem [shape: f32[16,32], index: 0, kind: input, shape index: {}]   ;;  %s419_s1 = inlined_call_operand.vmem [shape: bf16[32,88], index: 1, kind: input, shape index: {}]   ;;  %s420_s2 = inlined_call_operand.vmem [shape: f32[1,88], index: 2, kind: input, shape index: {}]   ;;  %s421_s3 = inlined_call_operand.vmem [shape: bf16[88,32], index: 3, kind: input, shape index: {}]   ;;  %s422_s4 = inlined_call_operand.vmem [shape: f32[1,32], index: 4, kind: input, shape index: {}]   ;;  %s423_s5 = inlined_call_operand.hbm [shape: f32[16,32], index: 5, kind: output, shape index: {}]  }
   0x1   :  { %v299_v0 = vld [vmem:[%s419_s1 + $0x8] sm:$0xff]   ;;  %270 = vmatprep.subr.bf16.mxu0 %v337_v1  ;;  %278 = vmatprep.subr.bf16.mxu1 %v337_v1  ;;  %v300_v2 = vld [vmem:[%s419_s1] sm:$0xff]   ;;  %27 = vst.msk [vmem:[#allocation2] sm:$0xff] %vm26_vm1, %v337_v1  ;;  %28 = vst.msk [vmem:[#allocation2 + $0x8] sm:$0xff] %vm26_vm1, %v337_v1 }
   0x2   :  { %271 = vmatpush3.bf16.msra.mxu0 %v299_v0  ;;  %274 = vmatprep.mubr.msk.bf16.mxu0 %vm338_vm0, %v337_v1  ;;  %v29_v3 = vld [vmem:[%s418_s0] sm:$0xff]  ;;  %v30_v4 = vld [vmem:[%s418_s0 + $0x8] sm:$0xff] }
   0x3   :  { %272 = vmatprep.subr.bf16.mxu0 %v337_v1  ;;  %290 = vmatprep.mubr.msk.bf16.mxu1 %vm338_vm0, %v337_v1  ;;  %v31_v5 = vpack.c.bf16 %v30_v4, %v29_v3 }
   0x6   :  { %273 = vmatpush3.bf16.msra.mxu0 %v300_v2 }
   0x7   :  { %10 = vsyncpa [#allocation4], 0  ;;  %v301_v6 = vld [vmem:[%s421_s3 + $0x28] ss:$0 sps:$4 sm:$0xff]   ;;  %vm165_vm2 = vcmask 1043456   ;;  %v302_v8 = vld [vmem:[%s421_s3 + $0x20] sm:$0xff]  }
   0x8   :  { %v167_v7 = vsel %vm165_vm2, %v301_v6, 0  ;;  %v303_v9 = vld [vmem:[%s421_s3 + $0x18] sm:$0xff]   ;;  %v304_v10 = vld [vmem:[%s421_s3 + $0x10] sm:$0xff]   ;;  %v305_v11 = vld [vmem:[%s421_s3 + $0x8] sm:$0xff]   ;;  %vm161_vm3 = vcmask 719872   ;;  %s339_s13 = smov [#allocation3]  }
   0x9   :  { %275 = vmatmul.mubr.msk.bf16.vlgmr.msra.gmra.mxu0 %vm26_vm1, %v31_v5  ;;  %279 = vmatpush3.bf16.msra.mxu1 %v167_v7  ;;  %v306_v12 = vld [vmem:[%s421_s3] sm:$0xff]   ;;  %v115_v35 = vld [vmem:[#allocation2 + $0x8] sm:$0xff]  ;;  %s235_s14 = sshll.u32 %s339_s13, 4  ;;  %s236_s14 = int_to_ptr.vmem [resolvable:$true] %s235_s14 }
   0xa   :  { %280 = vmatprep.subr.bf16.mxu1 %v337_v1  ;;  %v246_v13 = vld [vmem:[%s420_s2] ss:$0 sm:$0xff]  ;;  %s315_s15 = scalar_lea.vmem %s236_s14, 256  ;;  %p320_p1 = scmp.lt.s32.totalorder %s236_s14, %s236_s14 }
   0xb   :  { %v114_v31 = vld [vmem:[#allocation2] sm:$0xff]  ;;  %p316_p0 = scmp.ne.s32.totalorder %s236_s14, %s315_s15  ;;  %p321_p2 = scmp.lt.s32.totalorder %s315_s15, %s315_s15 }
   0xc   :  { %v259_v39 = vld [vmem:[%s422_s4] ss:$0 sm:$0xff] }
   0xd   :  { %281 = vmatpush3.bf16.msra.mxu1 %v302_v8  ;;  %p322_p3 = por %p321_p2, %p320_p1 }
   0xe   :  { %282 = vmatprep.subr.bf16.mxu1 %v337_v1 }
   0xf   :  { %p323_p4 = pnand %p322_p3, %p316_p0 }
  0x11   :  { %283 = vmatpush3.bf16.msra.mxu1 %v303_v9 }
  0x12   :  { %284 = vmatprep.subr.bf16.mxu1 %v337_v1 }
  0x15   :  { %285 = vmatpush3.bf16.msra.mxu1 %v304_v10 }
  0x16   :  { %286 = vmatprep.subr.bf16.mxu1 %v337_v1 }
  0x19   :  { %287 = vmatpush3.bf16.msra.mxu1 %v305_v11 }
  0x1a   :  { %288 = vmatprep.subr.bf16.mxu1 %v337_v1 }
  0x1d   :  { %289 = vmatpush3.bf16.msra.mxu1 %v306_v12 }
  0xc9   :  { %v93_v14 = vpop.f32.mrf.mxu0 }
  0xca   :  { %v94_v15 = vadd.f32 %v246_v13, %v93_v14 }
  0xcb   :  { %v276_v16 = vpop.f32.mrf.mxu0 }
  0xcc   :  { %v250_v17 = vmul.f32 -1.442695, %v94_v15 }
  0xcd   :  { %v96_v18 = vpop.f32.mrf.mxu0 }
  0xce   :  { %307 = vpow2.f32 %v250_v17  ;;  %v97_v19 = vadd.f32 %v246_v13, %v96_v18 }
  0xcf   :  { %v277_v20 = vpop.f32.mrf.mxu0 }
  0xd0   :  { %v251_v21 = vmul.f32 -1.442695, %v97_v19 }
  0xd2   :  { %309 = vpow2.f32 %v251_v21 }
  0xdb   :  { %v308_v22 = vpop.eup %307 }
  0xdc   :  { %v106_v23 = vadd.f32 1.0, %v308_v22 }
  0xde   :  { %311 = vrcp.f32 %v106_v23 }
  0xdf   :  { %v310_v24 = vpop.eup %309 }
  0xe0   :  { %v107_v25 = vadd.f32 1.0, %v310_v24 }
  0xe2   :  { %313 = vrcp.f32 %v107_v25 }
  0xeb   :  { %v312_v26 = vpop.eup %311 }
  0xec   :  { %v112_v28 = vmul.f32 %v312_v26, %v94_v15 }
  0xef   :  { %v314_v27 = vpop.eup %313 }
  0xf0   :  { %v113_v29 = vmul.f32 %v314_v27, %v97_v19 }
  0xf2   :  { %v116_v30 = vpack.c.bf16 %v113_v29, %v112_v28 }
  0xf4   :  { %291 = vmatmul.mubr.msk.bf16.vlgmr.msra.gmra.mxu1 %vm161_vm3, %v116_v30 }
 0x1b4   :  { %v203_v32 = vpop.f32.mrf.mxu1 }
 0x1b5   :  { %v210_v33 = vadd.f32 %v203_v32, %v114_v31 }
 0x1b6   :  { %v292_v34 = vpop.f32.mrf.mxu1 }
 0x1b7   :  { %212 = vst.msk [vmem:[#allocation2] sm:$0xff] %vm26_vm1, %v210_v33 }
 0x1b8   :  { %v206_v36 = vpop.f32.mrf.mxu1 }
 0x1b9   :  { %v211_v37 = vadd.f32 %v206_v36, %v115_v35 }
 0x1ba   :  { %v293_v38 = vpop.f32.mrf.mxu1 }
 0x1bb   :  { %213 = vst.msk [vmem:[#allocation2 + $0x8] sm:$0xff] %vm26_vm1, %v211_v37 }
 0x1be   :  { %v217_v40 = vld [vmem:[#allocation2] sm:$0xff] }
 0x1bf   :  { %v226_v41 = vadd.f32 %v259_v39, %v217_v40 }
 0x1c1   :  { %228 = vst.msk [vmem:[#allocation3] sm:$0xff] %vm26_vm1, %v226_v41 }
 0x1c2   :  { %v218_v42 = vld [vmem:[#allocation2 + $0x8] sm:$0xff] }
 0x1c3   :  { %v227_v43 = vadd.f32 %v259_v39, %v218_v42 }
 0x1c5   :  { %229 = vst.msk [vmem:[#allocation3 + $0x8] sm:$0xff] %vm26_vm1, %v227_v43 }
 0x1c6   :  { %326 = shalt.err (!%p323_p4)
}
 0x1c7   :  { %s340_s16 = smov 128   ;;  %s341_s4 = smov 8  }
 0x1c8   :  { %241 = dma.vmem_to_hbm [thread:$0]  %s236_s14, 256, %s423_s5, [#allocation4], %s340_s16, %s340_s16, %s341_s4  }
 0x1c9   :  { %335 = dma.done.wait [#allocation4], 256  }
 0x1ca   :  { %336 = vsyncadd [#allocation4], 4294967040 }
 0x1cb   :  { %245 = vsyncpa [#allocation4], 1 }

</bundles_post_ra>
